<compile_context>
chip_gen: v6e
topology: v6e:2x2x1
jax: 0.10.0
libtpu: 0.0.40
codegen_flags: <defaults>
</compile_context>

<pallas_src>
import math
import numpy as np

import jax
import jax.numpy as jnp
from jax.experimental import pallas as pl
from jax.experimental.pallas import tpu as pltpu

# ----------------------------- model config ---------------------------------
NUM_HIDDENS = 32            # H
NUM_HEADS = 4               # nh
BATCH = 2                   # B
SEQ = 8                     # S (query len == key/value len in the test)


# ----------------------- trace-time structural constants --------------------
def _build_constants(B, Sq, Skv, H, nh):
    """Numpy-built constants for the sublane/lane-stacked MHA (resident VMEM)."""
    dh = H // nh
    R = B * Sq                  # stacked query rows
    Rk = B * Skv                # stacked key/value rows
    Lb = B * nh * Skv           # lane-stacked score axis: (batch, head, key pos)

    m = np.arange(Lb)
    b_of = m // (nh * Skv)      # batch of lane column / stacked-KV row
    h_of = (m // Skv) % nh      # head
    j_of = m % Skv              # key position

    # Replicate each batch's projected K/V rows once per head: row m <- k[b*Skv + j].
    gather = np.zeros((Lb, Rk), np.float32)
    gather[m, b_of * Skv + j_of] = 1.0

    # Keep only head h_of's feature columns in the stacked K/V rows.
    keep = (np.arange(H)[None, :] // dh == h_of[:, None]).astype(np.float32)

    # Block-diagonal "ones": sums exp() within each (batch, head) lane segment.
    seg = m // Skv
    seg_ones = (seg[:, None] == seg[None, :]).astype(np.float32)

    # Row r belongs to batch r // Sq; lane column c to batch b_of[c].
    rb = (np.arange(R) // Sq).astype(np.int32)
    bmatch = (rb[:, None] == b_of[None, :]).astype(np.float32)      # [R, Lb]
    bbias = ((1.0 - bmatch) * -1e6).astype(np.float32)              # additive batch mask

    return dict(
        gather=jnp.asarray(gather),                                 # [Lb, Rk]
        keep=jnp.asarray(keep),                                     # [Lb, H]
        seg_ones=jnp.asarray(seg_ones),                             # [Lb, Lb]
        bbias=jnp.asarray(bbias),                                   # [R, Lb]
        bmatch=jnp.asarray(bmatch),                                 # [R, Lb]
        col_seg=jnp.asarray(seg.astype(np.int32)[None, :]),         # [1, Lb]
        col_pos=jnp.asarray(j_of.astype(np.int32)[None, :]),        # [1, Lb]
        row_batch=jnp.asarray(rb[:, None]),                         # [R, 1]
    )


# ------------------------------ Pallas kernel --------------------------------
def _make_kernel(B, Sq, Skv, H, nh):
    R = B * Sq
    n_seg = B * nh

    def kernel(vlen_ref,                               # SMEM scalar prefetch, [B] int32
               q_ref, k_ref, v_ref,                    # [B*Sq, H] / [B*Skv, H]
               wcat_ref,                               # [H, 4H] = (wq*scale | wk | wv | wo)
               gather_ref, keep_ref, segones_ref,      # structural constants
               bbias_ref, bmatch_ref,
               colseg_ref, colpos_ref, rowb_ref,
               out_ref):                               # [B*Sq, H]
        Rk = k_ref.shape[0]

        # ---- fused Q/K/V(+O) projection: ONE MXU issue on one resident weight ----
        xcat = jnp.concatenate([q_ref[...], k_ref[...], v_ref[...]], axis=0)   # [R+2Rk, H]
        wcat = wcat_ref[...]
        proj = jnp.dot(xcat, wcat, preferred_element_type=jnp.float32)          # [R+2Rk, 4H]
        q = proj[:R, 0:H]                           # already scaled by 1/sqrt(dh) via wq
        k = proj[R:R + Rk, H:2 * H]
        v = proj[R + Rk:R + 2 * Rk, 2 * H:3 * H]
        wo = wcat[:, 3 * H:4 * H]

        # ---- (batch, head)-block-structured K / V stacks along the lane axis ----
        keep = keep_ref[...]
        g = gather_ref[...]
        k_stack = jnp.dot(g, k, preferred_element_type=jnp.float32) * keep      # [Lb, H]
        v_stack = jnp.dot(g, v, preferred_element_type=jnp.float32) * keep      # [Lb, H]

        # ---- scores for ALL (batch, head) pairs in one matmul ----
        scores = jax.lax.dot_general(q, k_stack, (((1,), (1,)), ((), ())),
                                     preferred_element_type=jnp.float32)        # [R, Lb]
        scores = scores + bbias_ref[...]             # -1e6 on cross-batch columns

        # runtime valid-length mask (only data-dependent piece kept in-kernel)
        rowb = rowb_ref[...]                                                     # [R, 1]
        vlen_rows = jnp.zeros((R, 1), jnp.int32)
        for b in range(B):
            vlen_rows = jnp.where(rowb == b, vlen_ref[b], vlen_rows)
        scores = jnp.where(colpos_ref[...] < vlen_rows, scores, -1e6)

        # ---- segmented (per batch*head) softmax ----
        colseg = colseg_ref[...]                                                 # [1, Lb]
        m_full = jnp.zeros_like(scores)
        for s in range(n_seg):                        # per-segment max: robust to
            sel = colseg == s                         # cross-head scale gaps and
            m_s = jnp.max(jnp.where(sel, scores, -1e30), axis=-1, keepdims=True)
            m_full = jnp.where(sel, m_s, m_full)      # to valid_len == 0 rows
        e = jnp.exp(scores - m_full)
        denom = jnp.dot(e, segones_ref[...], preferred_element_type=jnp.float32)
        p = e * pl.reciprocal(denom, approx=True)     # EUP slot; denom >= 1 by construction
        p = p * bmatch_ref[...]                       # zero cross-batch probabilities

        # ---- P @ V -> concatenated heads; single output projection ----
        o = jnp.dot(p, v_stack, preferred_element_type=jnp.float32)             # [R, H]
        out = jnp.dot(o, wo, preferred_element_type=jnp.float32)                # [R, H]
        out_ref[...] = out.astype(out_ref.dtype)

    return kernel


# ------------------------------- wrapper -------------------------------------
def multi_head_attention(queries, keys, values, valid_lens, params):
    """MultiHeadAttention forward via ONE single-step pallas_call (batch collapsed)."""
    B, Sq, H = queries.shape
    Skv = keys.shape[1]
    nh = NUM_HEADS
    dh = H // nh
    R, Rk = B * Sq, B * Skv

    # Fold 1/sqrt(d_head) into W_q; fuse all four weights into one lane-dense
    # [H, 4H] = [32, 128] operand (one DMA, exactly one vreg lane width).
    w_cat = jnp.concatenate(
        [params["wq"] * (1.0 / math.sqrt(dh)), params["wk"], params["wv"], params["wo"]],
        axis=1)

    c = _build_constants(B, Sq, Skv, H, nh)
    q2d = queries.reshape(R, H)
    k2d = keys.reshape(Rk, H)
    v2d = values.reshape(Rk, H)

    inputs = (q2d, k2d, v2d, w_cat,
              c["gather"], c["keep"], c["seg_ones"],
              c["bbias"], c["bmatch"],
              c["col_seg"], c["col_pos"], c["row_batch"])

    def full_block(arr):
        nd = arr.ndim
        return pl.BlockSpec(arr.shape, lambda i, vl, _nd=nd: (0,) * _nd)

    grid_spec = pltpu.PrefetchScalarGridSpec(
        num_scalar_prefetch=1,
        grid=(1,),                                    # whole batch in one grid step
        in_specs=[full_block(a) for a in inputs],
        out_specs=pl.BlockSpec((R, H), lambda i, vl: (0, 0)),
    )
    out2d = pl.pallas_call(
        _make_kernel(B, Sq, Skv, H, nh),
        grid_spec=grid_spec,
        out_shape=jax.ShapeDtypeStruct((R, H), jnp.float32),
        compiler_params=pltpu.CompilerParams(dimension_semantics=("arbitrary",)),
    )(valid_lens.astype(jnp.int32), *inputs)
    # TODO(synk): lane-dense [B, Sq*H] store needs an in-kernel sublane->lane
    # relayout; the [B*Sq, H] slab is ~2 KB so the free wrapper reshape stays.
    return out2d.reshape(B, Sq, H)


# ---------------------------- params / reference ----------------------------
def init_params(key):
    ks = jax.random.split(key, 4)
    s = 0.1
    return {name: jax.random.normal(k, (NUM_HIDDENS, NUM_HIDDENS), jnp.float32) * s
            for name, k in zip(("wq", "wk", "wv", "wo"), ks)}


def mha_ref(queries, keys, values, valid_lens, params):
    """Pure-JAX reference matching the PyTorch MultiHeadAttention forward."""
    B, Sq, H = queries.shape
    Skv = keys.shape[1]
    nh, dh = NUM_HEADS, H // NUM_HEADS
    q = queries @ params["wq"]
    k = keys @ params["wk"]
    v = values @ params["wv"]

    def split(t, S):
        return t.reshape(B, S, nh, dh).transpose(0, 2, 1, 3)   # [B, nh, S, dh]

    qh, kh, vh = split(q, Sq), split(k, Skv), split(v, Skv)
    scores = jnp.einsum("bhqd,bhkd->bhqk", qh, kh) / math.sqrt(dh)
    mask = jnp.arange(Skv)[None, None, None, :] < valid_lens[:, None, None, None]
    scores = jnp.where(mask, scores, -1e6)
    p = jax.nn.softmax(scores, axis=-1)
    o = jnp.einsum("bhqk,bhkd->bhqd", p, vh).transpose(0, 2, 1, 3).reshape(B, Sq, H)
    return o @ params["wo"]


# ---------------------------------- main -------------------------------------
if __name__ == "__main__":
    key = jax.random.PRNGKey(0)
    kq, kk, kv, kp = jax.random.split(key, 4)

    queries = jax.random.normal(kq, (BATCH, SEQ, NUM_HIDDENS), jnp.float32)
    keys_in = jax.random.normal(kk, (BATCH, SEQ, NUM_HIDDENS), jnp.float32)
    values = jax.random.normal(kv, (BATCH, SEQ, NUM_HIDDENS), jnp.float32)
    valid_lens = jnp.array([5, 8], dtype=jnp.int32)
    params = init_params(kp)

    out = multi_head_attention(queries, keys_in, values, valid_lens, params)
    out = jax.block_until_ready(out)

    ref = mha_ref(queries, keys_in, values, valid_lens, params)
    # 1e-3 tolerance accounts for the EUP approximate reciprocal in the softmax.
    np.testing.assert_allclose(np.asarray(out), np.asarray(ref), atol=1e-3, rtol=1e-3)

    assert out.shape == (BATCH, SEQ, NUM_HIDDENS)
    print("KERNEL_OK")
</pallas_src>

<mosaic_0001>
module attributes {stable_mosaic.version = 11 : i64} {
  func.func @kernel(%arg0: i32, %arg1: memref<2xi32, #tpu.memory_space<smem>>, %arg2: memref<16x32xf32, #tpu.memory_space<vmem>>, %arg3: memref<16x32xf32, #tpu.memory_space<vmem>>, %arg4: memref<16x32xf32, #tpu.memory_space<vmem>>, %arg5: memref<32x128xf32, #tpu.memory_space<vmem>>, %arg6: memref<64x16xf32, #tpu.memory_space<vmem>>, %arg7: memref<64x32xf32, #tpu.memory_space<vmem>>, %arg8: memref<64x64xf32, #tpu.memory_space<vmem>>, %arg9: memref<16x64xf32, #tpu.memory_space<vmem>>, %arg10: memref<16x64xf32, #tpu.memory_space<vmem>>, %arg11: memref<1x64xi32, #tpu.memory_space<vmem>>, %arg12: memref<1x64xi32, #tpu.memory_space<vmem>>, %arg13: memref<16x1xi32, #tpu.memory_space<vmem>>, %arg14: memref<16x32xf32, #tpu.memory_space<vmem>>) attributes {dimension_semantics = [#tpu.dimension_semantics<arbitrary>], iteration_bounds = array<i64: 1>, scalar_prefetch = 1 : i64, scratch_operands = 0 : i64, tpu.core_type = #tpu.core_type<tc>, window_params = [{pipeline_mode = #tpu.pipeline_mode<synchronous>, transform_indices = @transform_0, window_bounds = array<i64: 16, 32>}, {pipeline_mode = #tpu.pipeline_mode<synchronous>, transform_indices = @transform_1, window_bounds = array<i64: 16, 32>}, {pipeline_mode = #tpu.pipeline_mode<synchronous>, transform_indices = @transform_2, window_bounds = array<i64: 16, 32>}, {pipeline_mode = #tpu.pipeline_mode<synchronous>, transform_indices = @transform_3, window_bounds = array<i64: 32, 128>}, {pipeline_mode = #tpu.pipeline_mode<synchronous>, transform_indices = @transform_4, window_bounds = array<i64: 64, 16>}, {pipeline_mode = #tpu.pipeline_mode<synchronous>, transform_indices = @transform_5, window_bounds = array<i64: 64, 32>}, {pipeline_mode = #tpu.pipeline_mode<synchronous>, transform_indices = @transform_6, window_bounds = array<i64: 64, 64>}, {pipeline_mode = #tpu.pipeline_mode<synchronous>, transform_indices = @transform_7, window_bounds = array<i64: 16, 64>}, {pipeline_mode = #tpu.pipeline_mode<synchronous>, transform_indices = @transform_8, window_bounds = array<i64: 16, 64>}, {pipeline_mode = #tpu.pipeline_mode<synchronous>, transform_indices = @transform_9, window_bounds = array<i64: 1, 64>}, {pipeline_mode = #tpu.pipeline_mode<synchronous>, transform_indices = @transform_10, window_bounds = array<i64: 1, 64>}, {pipeline_mode = #tpu.pipeline_mode<synchronous>, transform_indices = @transform_11, window_bounds = array<i64: 16, 1>}, {pipeline_mode = #tpu.pipeline_mode<synchronous>, transform_indices = @transform_12, window_bounds = array<i64: 16, 32>}]} {
    %c0 = arith.constant 0 : index
    %c0_0 = arith.constant 0 : index
    %0 = vector.load %arg2[%c0, %c0_0] : memref<16x32xf32, #tpu.memory_space<vmem>>, vector<16x32xf32>
    %c0_1 = arith.constant 0 : index
    %c0_2 = arith.constant 0 : index
    %1 = vector.load %arg3[%c0_1, %c0_2] : memref<16x32xf32, #tpu.memory_space<vmem>>, vector<16x32xf32>
    %c0_3 = arith.constant 0 : index
    %c0_4 = arith.constant 0 : index
    %2 = vector.load %arg4[%c0_3, %c0_4] : memref<16x32xf32, #tpu.memory_space<vmem>>, vector<16x32xf32>
    %3 = tpu.concatenate %0, %1, %2 in 0 : vector<16x32xf32>, vector<16x32xf32>, vector<16x32xf32> -> vector<48x32xf32>
    %c0_5 = arith.constant 0 : index
    %c0_6 = arith.constant 0 : index
    %4 = vector.load %arg5[%c0_5, %c0_6] : memref<32x128xf32, #tpu.memory_space<vmem>>, vector<32x128xf32>
    %cst = arith.constant dense<0.000000e+00> : vector<48x128xf32>
    %5 = tpu.matmul %3, %4, %cst {dimension_numbers = #tpu.dot_dimension_numbers<[1], [0], [0], [1], [0, 0, 1, 1], [], []>} : vector<48x32xf32>, vector<32x128xf32>, vector<48x128xf32> -> vector<48x128xf32>
    %6 = vector.extract_strided_slice %5 {offsets = [0, 0], sizes = [16, 32], strides = [1, 1]} : vector<48x128xf32> to vector<16x32xf32>
    %7 = vector.extract_strided_slice %5 {offsets = [16, 32], sizes = [16, 32], strides = [1, 1]} : vector<48x128xf32> to vector<16x32xf32>
    %8 = vector.extract_strided_slice %5 {offsets = [32, 64], sizes = [16, 32], strides = [1, 1]} : vector<48x128xf32> to vector<16x32xf32>
    %9 = vector.extract_strided_slice %4 {offsets = [0, 96], sizes = [32, 32], strides = [1, 1]} : vector<32x128xf32> to vector<32x32xf32>
    %c0_7 = arith.constant 0 : index
    %c0_8 = arith.constant 0 : index
    %10 = vector.load %arg7[%c0_7, %c0_8] : memref<64x32xf32, #tpu.memory_space<vmem>>, vector<64x32xf32>
    %c0_9 = arith.constant 0 : index
    %c0_10 = arith.constant 0 : index
    %11 = vector.load %arg6[%c0_9, %c0_10] : memref<64x16xf32, #tpu.memory_space<vmem>>, vector<64x16xf32>
    %cst_11 = arith.constant dense<0.000000e+00> : vector<64x32xf32>
    %12 = tpu.matmul %11, %7, %cst_11 {dimension_numbers = #tpu.dot_dimension_numbers<[1], [0], [0], [1], [0, 0, 1, 1], [], []>} : vector<64x16xf32>, vector<16x32xf32>, vector<64x32xf32> -> vector<64x32xf32>
    %13 = arith.mulf %12, %10 : vector<64x32xf32>
    %cst_12 = arith.constant dense<0.000000e+00> : vector<64x32xf32>
    %14 = tpu.matmul %11, %8, %cst_12 {dimension_numbers = #tpu.dot_dimension_numbers<[1], [0], [0], [1], [0, 0, 1, 1], [], []>} : vector<64x16xf32>, vector<16x32xf32>, vector<64x32xf32> -> vector<64x32xf32>
    %15 = arith.mulf %14, %10 : vector<64x32xf32>
    %cst_13 = arith.constant dense<0.000000e+00> : vector<16x64xf32>
    %16 = tpu.matmul %6, %13, %cst_13 {dimension_numbers = #tpu.dot_dimension_numbers<[1], [1], [0], [0], [0, 0, 1, 0], [], []>} : vector<16x32xf32>, vector<64x32xf32>, vector<16x64xf32> -> vector<16x64xf32>
    %c0_14 = arith.constant 0 : index
    %c0_15 = arith.constant 0 : index
    %17 = vector.load %arg9[%c0_14, %c0_15] : memref<16x64xf32, #tpu.memory_space<vmem>>, vector<16x64xf32>
    %18 = arith.addf %16, %17 : vector<16x64xf32>
    %c0_16 = arith.constant 0 : index
    %c0_17 = arith.constant 0 : index
    %19 = vector.load %arg13[%c0_16, %c0_17] : memref<16x1xi32, #tpu.memory_space<vmem>>, vector<16x1xi32>
    %c0_i32 = arith.constant 0 : i32
    %20 = vector.broadcast %c0_i32 : i32 to vector<16x1xi32>
    %c0_i32_18 = arith.constant 0 : i32
    %21 = vector.broadcast %c0_i32_18 : i32 to vector<16x1xi32>
    %22 = arith.cmpi eq, %19, %21 : vector<16x1xi32>
    %c0_19 = arith.constant 0 : index
    %23 = memref.load %arg1[%c0_19] : memref<2xi32, #tpu.memory_space<smem>>
    %24 = vector.broadcast %23 : i32 to vector<16x1xi32>
    %25 = arith.select %22, %24, %20 : vector<16x1xi1>, vector<16x1xi32>
    %c1_i32 = arith.constant 1 : i32
    %26 = vector.broadcast %c1_i32 : i32 to vector<16x1xi32>
    %27 = arith.cmpi eq, %19, %26 : vector<16x1xi32>
    %c1 = arith.constant 1 : index
    %28 = memref.load %arg1[%c1] : memref<2xi32, #tpu.memory_space<smem>>
    %29 = vector.broadcast %28 : i32 to vector<16x1xi32>
    %30 = arith.select %27, %29, %25 : vector<16x1xi1>, vector<16x1xi32>
    %c0_20 = arith.constant 0 : index
    %c0_21 = arith.constant 0 : index
    %31 = vector.load %arg12[%c0_20, %c0_21] : memref<1x64xi32, #tpu.memory_space<vmem>>, vector<1x64xi32>
    %32 = vector.broadcast %31 : vector<1x64xi32> to vector<16x64xi32>
    %33 = vector.broadcast %30 : vector<16x1xi32> to vector<16x64xi32>
    %34 = arith.cmpi slt, %32, %33 : vector<16x64xi32>
    %cst_22 = arith.constant -1.000000e+06 : f32
    %35 = vector.broadcast %cst_22 : f32 to vector<16x64xf32>
    %36 = arith.select %34, %18, %35 : vector<16x64xi1>, vector<16x64xf32>
    %c0_23 = arith.constant 0 : index
    %c0_24 = arith.constant 0 : index
    %37 = vector.load %arg11[%c0_23, %c0_24] : memref<1x64xi32, #tpu.memory_space<vmem>>, vector<1x64xi32>
    %cst_25 = arith.constant 0.000000e+00 : f32
    %38 = vector.broadcast %cst_25 : f32 to vector<16x64xf32>
    %c0_i32_26 = arith.constant 0 : i32
    %39 = vector.broadcast %c0_i32_26 : i32 to vector<1x64xi32>
    %40 = arith.cmpi eq, %37, %39 : vector<1x64xi32>
    %cst_27 = arith.constant -1.000000e+30 : f32
    %41 = vector.shape_cast %40 : vector<1x64xi1> to vector<1x64xi1>
    %42 = vector.broadcast %41 : vector<1x64xi1> to vector<16x64xi1>
    %43 = vector.broadcast %cst_27 : f32 to vector<16x64xf32>
    %44 = arith.select %42, %36, %43 : vector<16x64xi1>, vector<16x64xf32>
    %cst_28 = arith.constant dense<0xFF800000> : vector<16xf32>
    %45 = vector.multi_reduction <maximumf>, %44, %cst_28 [1] : vector<16x64xf32> to vector<16xf32>
    %46 = vector.shape_cast %45 : vector<16xf32> to vector<16x1xf32>
    %47 = vector.shape_cast %40 : vector<1x64xi1> to vector<1x64xi1>
    %48 = vector.broadcast %47 : vector<1x64xi1> to vector<16x64xi1>
    %49 = vector.shape_cast %46 : vector<16x1xf32> to vector<16x1xf32>
    %50 = vector.broadcast %49 : vector<16x1xf32> to vector<16x64xf32>
    %51 = arith.select %48, %50, %38 : vector<16x64xi1>, vector<16x64xf32>
    %c1_i32_29 = arith.constant 1 : i32
    %52 = vector.broadcast %c1_i32_29 : i32 to vector<1x64xi32>
    %53 = arith.cmpi eq, %37, %52 : vector<1x64xi32>
    %cst_30 = arith.constant -1.000000e+30 : f32
    %54 = vector.shape_cast %53 : vector<1x64xi1> to vector<1x64xi1>
    %55 = vector.broadcast %54 : vector<1x64xi1> to vector<16x64xi1>
    %56 = vector.broadcast %cst_30 : f32 to vector<16x64xf32>
    %57 = arith.select %55, %36, %56 : vector<16x64xi1>, vector<16x64xf32>
    %cst_31 = arith.constant dense<0xFF800000> : vector<16xf32>
    %58 = vector.multi_reduction <maximumf>, %57, %cst_31 [1] : vector<16x64xf32> to vector<16xf32>
    %59 = vector.shape_cast %58 : vector<16xf32> to vector<16x1xf32>
    %60 = vector.shape_cast %53 : vector<1x64xi1> to vector<1x64xi1>
    %61 = vector.broadcast %60 : vector<1x64xi1> to vector<16x64xi1>
    %62 = vector.shape_cast %59 : vector<16x1xf32> to vector<16x1xf32>
    %63 = vector.broadcast %62 : vector<16x1xf32> to vector<16x64xf32>
    %64 = arith.select %61, %63, %51 : vector<16x64xi1>, vector<16x64xf32>
    %c2_i32 = arith.constant 2 : i32
    %65 = vector.broadcast %c2_i32 : i32 to vector<1x64xi32>
    %66 = arith.cmpi eq, %37, %65 : vector<1x64xi32>
    %cst_32 = arith.constant -1.000000e+30 : f32
    %67 = vector.shape_cast %66 : vector<1x64xi1> to vector<1x64xi1>
    %68 = vector.broadcast %67 : vector<1x64xi1> to vector<16x64xi1>
    %69 = vector.broadcast %cst_32 : f32 to vector<16x64xf32>
    %70 = arith.select %68, %36, %69 : vector<16x64xi1>, vector<16x64xf32>
    %cst_33 = arith.constant dense<0xFF800000> : vector<16xf32>
    %71 = vector.multi_reduction <maximumf>, %70, %cst_33 [1] : vector<16x64xf32> to vector<16xf32>
    %72 = vector.shape_cast %71 : vector<16xf32> to vector<16x1xf32>
    %73 = vector.shape_cast %66 : vector<1x64xi1> to vector<1x64xi1>
    %74 = vector.broadcast %73 : vector<1x64xi1> to vector<16x64xi1>
    %75 = vector.shape_cast %72 : vector<16x1xf32> to vector<16x1xf32>
    %76 = vector.broadcast %75 : vector<16x1xf32> to vector<16x64xf32>
    %77 = arith.select %74, %76, %64 : vector<16x64xi1>, vector<16x64xf32>
    %c3_i32 = arith.constant 3 : i32
    %78 = vector.broadcast %c3_i32 : i32 to vector<1x64xi32>
    %79 = arith.cmpi eq, %37, %78 : vector<1x64xi32>
    %cst_34 = arith.constant -1.000000e+30 : f32
    %80 = vector.shape_cast %79 : vector<1x64xi1> to vector<1x64xi1>
    %81 = vector.broadcast %80 : vector<1x64xi1> to vector<16x64xi1>
    %82 = vector.broadcast %cst_34 : f32 to vector<16x64xf32>
    %83 = arith.select %81, %36, %82 : vector<16x64xi1>, vector<16x64xf32>
    %cst_35 = arith.constant dense<0xFF800000> : vector<16xf32>
    %84 = vector.multi_reduction <maximumf>, %83, %cst_35 [1] : vector<16x64xf32> to vector<16xf32>
    %85 = vector.shape_cast %84 : vector<16xf32> to vector<16x1xf32>
    %86 = vector.shape_cast %79 : vector<1x64xi1> to vector<1x64xi1>
    %87 = vector.broadcast %86 : vector<1x64xi1> to vector<16x64xi1>
    %88 = vector.shape_cast %85 : vector<16x1xf32> to vector<16x1xf32>
    %89 = vector.broadcast %88 : vector<16x1xf32> to vector<16x64xf32>
    %90 = arith.select %87, %89, %77 : vector<16x64xi1>, vector<16x64xf32>
    %c4_i32 = arith.constant 4 : i32
    %91 = vector.broadcast %c4_i32 : i32 to vector<1x64xi32>
    %92 = arith.cmpi eq, %37, %91 : vector<1x64xi32>
    %cst_36 = arith.constant -1.000000e+30 : f32
    %93 = vector.shape_cast %92 : vector<1x64xi1> to vector<1x64xi1>
    %94 = vector.broadcast %93 : vector<1x64xi1> to vector<16x64xi1>
    %95 = vector.broadcast %cst_36 : f32 to vector<16x64xf32>
    %96 = arith.select %94, %36, %95 : vector<16x64xi1>, vector<16x64xf32>
    %cst_37 = arith.constant dense<0xFF800000> : vector<16xf32>
    %97 = vector.multi_reduction <maximumf>, %96, %cst_37 [1] : vector<16x64xf32> to vector<16xf32>
    %98 = vector.shape_cast %97 : vector<16xf32> to vector<16x1xf32>
    %99 = vector.shape_cast %92 : vector<1x64xi1> to vector<1x64xi1>
    %100 = vector.broadcast %99 : vector<1x64xi1> to vector<16x64xi1>
    %101 = vector.shape_cast %98 : vector<16x1xf32> to vector<16x1xf32>
    %102 = vector.broadcast %101 : vector<16x1xf32> to vector<16x64xf32>
    %103 = arith.select %100, %102, %90 : vector<16x64xi1>, vector<16x64xf32>
    %c5_i32 = arith.constant 5 : i32
    %104 = vector.broadcast %c5_i32 : i32 to vector<1x64xi32>
    %105 = arith.cmpi eq, %37, %104 : vector<1x64xi32>
    %cst_38 = arith.constant -1.000000e+30 : f32
    %106 = vector.shape_cast %105 : vector<1x64xi1> to vector<1x64xi1>
    %107 = vector.broadcast %106 : vector<1x64xi1> to vector<16x64xi1>
    %108 = vector.broadcast %cst_38 : f32 to vector<16x64xf32>
    %109 = arith.select %107, %36, %108 : vector<16x64xi1>, vector<16x64xf32>
    %cst_39 = arith.constant dense<0xFF800000> : vector<16xf32>
    %110 = vector.multi_reduction <maximumf>, %109, %cst_39 [1] : vector<16x64xf32> to vector<16xf32>
    %111 = vector.shape_cast %110 : vector<16xf32> to vector<16x1xf32>
    %112 = vector.shape_cast %105 : vector<1x64xi1> to vector<1x64xi1>
    %113 = vector.broadcast %112 : vector<1x64xi1> to vector<16x64xi1>
    %114 = vector.shape_cast %111 : vector<16x1xf32> to vector<16x1xf32>
    %115 = vector.broadcast %114 : vector<16x1xf32> to vector<16x64xf32>
    %116 = arith.select %113, %115, %103 : vector<16x64xi1>, vector<16x64xf32>
    %c6_i32 = arith.constant 6 : i32
    %117 = vector.broadcast %c6_i32 : i32 to vector<1x64xi32>
    %118 = arith.cmpi eq, %37, %117 : vector<1x64xi32>
    %cst_40 = arith.constant -1.000000e+30 : f32
    %119 = vector.shape_cast %118 : vector<1x64xi1> to vector<1x64xi1>
    %120 = vector.broadcast %119 : vector<1x64xi1> to vector<16x64xi1>
    %121 = vector.broadcast %cst_40 : f32 to vector<16x64xf32>
    %122 = arith.select %120, %36, %121 : vector<16x64xi1>, vector<16x64xf32>
    %cst_41 = arith.constant dense<0xFF800000> : vector<16xf32>
    %123 = vector.multi_reduction <maximumf>, %122, %cst_41 [1] : vector<16x64xf32> to vector<16xf32>
    %124 = vector.shape_cast %123 : vector<16xf32> to vector<16x1xf32>
    %125 = vector.shape_cast %118 : vector<1x64xi1> to vector<1x64xi1>
    %126 = vector.broadcast %125 : vector<1x64xi1> to vector<16x64xi1>
    %127 = vector.shape_cast %124 : vector<16x1xf32> to vector<16x1xf32>
    %128 = vector.broadcast %127 : vector<16x1xf32> to vector<16x64xf32>
    %129 = arith.select %126, %128, %116 : vector<16x64xi1>, vector<16x64xf32>
    %c7_i32 = arith.constant 7 : i32
    %130 = vector.broadcast %c7_i32 : i32 to vector<1x64xi32>
    %131 = arith.cmpi eq, %37, %130 : vector<1x64xi32>
    %cst_42 = arith.constant -1.000000e+30 : f32
    %132 = vector.shape_cast %131 : vector<1x64xi1> to vector<1x64xi1>
    %133 = vector.broadcast %132 : vector<1x64xi1> to vector<16x64xi1>
    %134 = vector.broadcast %cst_42 : f32 to vector<16x64xf32>
    %135 = arith.select %133, %36, %134 : vector<16x64xi1>, vector<16x64xf32>
    %cst_43 = arith.constant dense<0xFF800000> : vector<16xf32>
    %136 = vector.multi_reduction <maximumf>, %135, %cst_43 [1] : vector<16x64xf32> to vector<16xf32>
    %137 = vector.shape_cast %136 : vector<16xf32> to vector<16x1xf32>
    %138 = vector.shape_cast %131 : vector<1x64xi1> to vector<1x64xi1>
    %139 = vector.broadcast %138 : vector<1x64xi1> to vector<16x64xi1>
    %140 = vector.shape_cast %137 : vector<16x1xf32> to vector<16x1xf32>
    %141 = vector.broadcast %140 : vector<16x1xf32> to vector<16x64xf32>
    %142 = arith.select %139, %141, %129 : vector<16x64xi1>, vector<16x64xf32>
    %143 = arith.subf %36, %142 : vector<16x64xf32>
    %144 = math.exp %143 : vector<16x64xf32>
    %c0_44 = arith.constant 0 : index
    %c0_45 = arith.constant 0 : index
    %145 = vector.load %arg8[%c0_44, %c0_45] : memref<64x64xf32, #tpu.memory_space<vmem>>, vector<64x64xf32>
    %cst_46 = arith.constant dense<0.000000e+00> : vector<16x64xf32>
    %146 = tpu.matmul %144, %145, %cst_46 {dimension_numbers = #tpu.dot_dimension_numbers<[1], [0], [0], [1], [0, 0, 1, 1], [], []>} : vector<16x64xf32>, vector<64x64xf32>, vector<16x64xf32> -> vector<16x64xf32>
    %147 = tpu.reciprocal %146 {approx = true} : vector<16x64xf32> -> vector<16x64xf32>
    %148 = arith.mulf %144, %147 : vector<16x64xf32>
    %c0_47 = arith.constant 0 : index
    %c0_48 = arith.constant 0 : index
    %149 = vector.load %arg10[%c0_47, %c0_48] : memref<16x64xf32, #tpu.memory_space<vmem>>, vector<16x64xf32>
    %150 = arith.mulf %148, %149 : vector<16x64xf32>
    %cst_49 = arith.constant dense<0.000000e+00> : vector<16x32xf32>
    %151 = tpu.matmul %150, %15, %cst_49 {dimension_numbers = #tpu.dot_dimension_numbers<[1], [0], [0], [1], [0, 0, 1, 1], [], []>} : vector<16x64xf32>, vector<64x32xf32>, vector<16x32xf32> -> vector<16x32xf32>
    %cst_50 = arith.constant dense<0.000000e+00> : vector<16x32xf32>
    %152 = tpu.matmul %151, %9, %cst_50 {dimension_numbers = #tpu.dot_dimension_numbers<[1], [0], [0], [1], [0, 0, 1, 1], [], []>} : vector<16x32xf32>, vector<32x32xf32>, vector<16x32xf32> -> vector<16x32xf32>
    %c0_51 = arith.constant 0 : index
    %c0_52 = arith.constant 0 : index
    %153 = vector.load %arg14[%c0_51, %c0_52] : memref<16x32xf32, #tpu.memory_space<vmem>>, vector<16x32xf32>
    tpu.vector_store %arg14[%c0_51, %c0_52], %152 {strides = array<i32>} : memref<16x32xf32, #tpu.memory_space<vmem>>, vector<16x32xf32>,
    return
  }
  func.func @transform_0(%arg0: i32, %arg1: memref<2xi32, #tpu.memory_space<smem>>) -> (i32, i32) {
    %c0_i32 = arith.constant 0 : i32
    %c0_i32_0 = arith.constant 0 : i32
    %c0_i32_1 = arith.constant 0 : i32
    return %c0_i32, %c0_i32_0 : i32, i32
  }
  func.func @transform_1(%arg0: i32, %arg1: memref<2xi32, #tpu.memory_space<smem>>) -> (i32, i32) {
    %c0_i32 = arith.constant 0 : i32
    %c0_i32_0 = arith.constant 0 : i32
    %c0_i32_1 = arith.constant 0 : i32
    return %c0_i32, %c0_i32_0 : i32, i32
  }
  func.func @transform_2(%arg0: i32, %arg1: memref<2xi32, #tpu.memory_space<smem>>) -> (i32, i32) {
    %c0_i32 = arith.constant 0 : i32
    %c0_i32_0 = arith.constant 0 : i32
    %c0_i32_1 = arith.constant 0 : i32
    return %c0_i32, %c0_i32_0 : i32, i32
  }
  func.func @transform_3(%arg0: i32, %arg1: memref<2xi32, #tpu.memory_space<smem>>) -> (i32, i32) {
    %c0_i32 = arith.constant 0 : i32
    %c0_i32_0 = arith.constant 0 : i32
    %c0_i32_1 = arith.constant 0 : i32
    return %c0_i32, %c0_i32_0 : i32, i32
  }
  func.func @transform_4(%arg0: i32, %arg1: memref<2xi32, #tpu.memory_space<smem>>) -> (i32, i32) {
    %c0_i32 = arith.constant 0 : i32
    %c0_i32_0 = arith.constant 0 : i32
    %c0_i32_1 = arith.constant 0 : i32
    return %c0_i32, %c0_i32_0 : i32, i32
  }
  func.func @transform_5(%arg0: i32, %arg1: memref<2xi32, #tpu.memory_space<smem>>) -> (i32, i32) {
    %c0_i32 = arith.constant 0 : i32
    %c0_i32_0 = arith.constant 0 : i32
    %c0_i32_1 = arith.constant 0 : i32
    return %c0_i32, %c0_i32_0 : i32, i32
  }
  func.func @transform_6(%arg0: i32, %arg1: memref<2xi32, #tpu.memory_space<smem>>) -> (i32, i32) {
    %c0_i32 = arith.constant 0 : i32
    %c0_i32_0 = arith.constant 0 : i32
    %c0_i32_1 = arith.constant 0 : i32
    return %c0_i32, %c0_i32_0 : i32, i32
  }
  func.func @transform_7(%arg0: i32, %arg1: memref<2xi32, #tpu.memory_space<smem>>) -> (i32, i32) {
    %c0_i32 = arith.constant 0 : i32
    %c0_i32_0 = arith.constant 0 : i32
    %c0_i32_1 = arith.constant 0 : i32
    return %c0_i32, %c0_i32_0 : i32, i32
  }
  func.func @transform_8(%arg0: i32, %arg1: memref<2xi32, #tpu.memory_space<smem>>) -> (i32, i32) {
    %c0_i32 = arith.constant 0 : i32
    %c0_i32_0 = arith.constant 0 : i32
    %c0_i32_1 = arith.constant 0 : i32
    return %c0_i32, %c0_i32_0 : i32, i32
  }
  func.func @transform_9(%arg0: i32, %arg1: memref<2xi32, #tpu.memory_space<smem>>) -> (i32, i32) {
    %c0_i32 = arith.constant 0 : i32
    %c0_i32_0 = arith.constant 0 : i32
    %c0_i32_1 = arith.constant 0 : i32
    return %c0_i32, %c0_i32_0 : i32, i32
  }
  func.func @transform_10(%arg0: i32, %arg1: memref<2xi32, #tpu.memory_space<smem>>) -> (i32, i32) {
    %c0_i32 = arith.constant 0 : i32
    %c0_i32_0 = arith.constant 0 : i32
    %c0_i32_1 = arith.constant 0 : i32
    return %c0_i32, %c0_i32_0 : i32, i32
  }
  func.func @transform_11(%arg0: i32, %arg1: memref<2xi32, #tpu.memory_space<smem>>) -> (i32, i32) {
    %c0_i32 = arith.constant 0 : i32
    %c0_i32_0 = arith.constant 0 : i32
    %c0_i32_1 = arith.constant 0 : i32
    return %c0_i32, %c0_i32_0 : i32, i32
  }
  func.func @transform_12(%arg0: i32, %arg1: memref<2xi32, #tpu.memory_space<smem>>) -> (i32, i32) {
    %c0_i32 = arith.constant 0 : i32
    %c0_i32_0 = arith.constant 0 : i32
    %c0_i32_1 = arith.constant 0 : i32
    return %c0_i32, %c0_i32_0 : i32, i32
  }
}

</mosaic_0001>

<bundles_post_ra>
// kernel: tpu_custom_call.1
= control target key start
LH: loop header
LB: loop body
LE: loop exit
PB: predicated region body
PF: predicated region fallthrough
CT: control target
= control target key end

     0   :  { %s1853_s0 = inlined_call_operand.vmem [shape: s32[2], index: 0, kind: input, shape index: {}]   ;;  %s1854_s1 = inlined_call_operand.vmem [shape: f32[16,32], index: 1, kind: input, shape index: {}]   ;;  %s1855_s2 = inlined_call_operand.vmem [shape: f32[16,32], index: 2, kind: input, shape index: {}]   ;;  %s1856_s3 = inlined_call_operand.vmem [shape: f32[16,32], index: 3, kind: input, shape index: {}]   ;;  %s1857_s4 = inlined_call_operand.vmem [shape: f32[32,128], index: 4, kind: input, shape index: {}]   ;;  %s1858_s5 = inlined_call_operand.vmem [shape: f32[64,16], index: 5, kind: input, shape index: {}]   ;;  %s1859_s6 = inlined_call_operand.vmem [shape: f32[64,32], index: 6, kind: input, shape index: {}]   ;;  %s1860_s7 = inlined_call_operand.vmem [shape: f32[64,64], index: 7, kind: input, shape index: {}]   ;;  %s1861_s8 = inlined_call_operand.vmem [shape: f32[16,64], index: 8, kind: input, shape index: {}]   ;;  %s1862_s9 = inlined_call_operand.hbm [shape: f32[16,64], index: 9, kind: input, shape index: {}]   ;;  %s1863_s10 = inlined_call_operand.vmem [shape: s32[1,64], index: 10, kind: input, shape index: {}]   ;;  %s1864_s11 = inlined_call_operand.vmem [shape: s32[1,64], index: 11, kind: input, shape index: {}]   ;;  %s1865_s12 = inlined_call_operand.vmem [shape: s32[16,1], index: 12, kind: input, shape index: {}]   ;;  %s1866_s13 = inlined_call_operand.hbm [shape: f32[16,32], index: 13, kind: output, shape index: {}]  }
   0x1   :  { %s18_s27 = sshll.u32 %s1853_s0, 4  ;;  %s19_s27 = int_to_ptr.vmem [resolvable:$true] %s18_s27 }
   0x2   :  { %s1286_s28 = scalar_lea.vmem %s19_s27, 16  ;;  %p1291_p1 = scmp.lt.s32.totalorder %s19_s27, %s19_s27 }
   0x3   :  { %p1287_p0 = scmp.ne.s32.totalorder %s19_s27, %s1286_s28  ;;  %p1292_p2 = scmp.lt.s32.totalorder %s1286_s28, %s1286_s28 }
   0x5   :  { %p1293_p3 = por %p1292_p2, %p1291_p1 }
   0x7   :  { %p1294_p4 = pnand %p1293_p3, %p1287_p0 }
   0x9   :  { %1297 = shalt.err (!%p1294_p4)  }
   0xa   :  { %s1344_s29 = smov [#allocation3]  }
   0xb   :  { %21 = dma.vmem_to_smem %s19_s27, 16, %s1344_s29, [#allocation2] }
   0xc   :  { %1338 = dma.done.wait [#allocation2], 16 }
   0xd   :  { %1339 = vsyncadd [#allocation2], 4294967280 }
   0xe   :  { %23 = sfence }
   0xf   :  { %24 = vsyncpa [#allocation5], 0 }
  0x10   :  { %25 = vsyncpa [#allocation6], 0  ;;  %s1345_s30 = smov [#allocation4]  }
  0x11   :  { %s47_s14 = sshll.u32 %s1345_s30, 4  ;;  %s48_s14 = int_to_ptr.vmem [resolvable:$true] %s47_s14 }
  0x12   :  { %s1306_s15 = scalar_lea.vmem %s48_s14, 256  ;;  %p1311_p6 = scmp.lt.s32.totalorder %s48_s14, %s48_s14 }
  0x13   :  { %p1307_p5 = scmp.ne.s32.totalorder %s48_s14, %s1306_s15  ;;  %p1312_p7 = scmp.lt.s32.totalorder %s1306_s15, %s1306_s15 }
  0x15   :  { %p1313_p8 = por %p1312_p7, %p1311_p6 }
  0x17   :  { %p1314_p9 = pnand %p1313_p8, %p1307_p5 }
  0x19   :  { %1317 = shalt.err (!%p1314_p9)
}
  0x1a   :  { %s1346_s0 = smov 128   ;;  %s1347_s16 = smov 8  }
  0x1b   :  { %53 = dma.hbm_to_vmem [thread:$0]  %s1862_s9, 256, %s48_s14, [#allocation5], %s1346_s0, %s1346_s0, %s1347_s16  }
  0x1c   :  { %1340 = dma.done.wait [#allocation5], 256  }
  0x1d   :  { %1341 = vsyncadd [#allocation5], 4294967040  ;;  %vm73_vm0 = vcmask 261120   ;;  %v1435_v0 = vld [vmem:[%s1857_s4 + $0x18] sm:$0xff]  ;;  %v1440_v1 = vld [vmem:[%s1857_s4 + $0x10] sm:$0xff]  ;;  %vm211_vm1 = vcmask 130048   ;;  %v609_v57 = vlaneseq }
  0x1e   :  { %1150 = vmatprep.subr.mxu0 %v1435_v0  ;;  %v63_v2 = vld [vmem:[%s1854_s1] sm:$0xff]  ;;  %v1450_v3 = vld [vmem:[%s1857_s4 + $0x8] sm:$0xff]  ;;  %s1348_s18 = smov 96   ;;  %v1490_v16 = vld [vmem:[%s1858_s5 + $0x10] sm:$0xff]  ;;  %v1349_v24 = vmov 0   ;;  %vm616_vm14 = vcmask 523264  }
  0x1f   :  { %1151 = vmatpush3.msra.mxu0 %v1435_v0  ;;  %1158 = vmatprep.mubr.msk.f32.mxu0 %vm73_vm0, %v63_v2  ;;  %v1458_v4 = vld [vmem:[%s1857_s4] sm:$0xff]  ;;  %v64_v5 = vld [vmem:[%s1854_s1 + $0x8] sm:$0xff]  ;;  %v1499_v17 = vld [vmem:[%s1858_s5 + $0x18] sm:$0xff]  ;;  %s581_s1 = sld [smem:[#allocation3]]  ;;  %v610_v59 = vshrl.u32 %v609_v57, 7  ;;  %s1351_s4 = smov 32  }
  0x20   :  { %1152 = vmatprep.subr.mxu0 %v1440_v1  ;;  %v65_v6 = vld [vmem:[%s1855_s2] sm:$0xff]  ;;  %v66_v7 = vld [vmem:[%s1855_s2 + $0x8] sm:$0xff]  ;;  %v1518_v20 = vld [vmem:[%s1858_s5 + $0x30] sm:$0xff]  ;;  %1276 = vset.pattern.permute.xlu1 %v1349_v24  ;;  %s1076_s2 = sld [smem:[#allocation3 + $0x1]] }
  0x21   :  { %1153 = vmatpush3.msra.mxu0 %v1440_v1  ;;  %v195_v8 = vld [vmem:[%s1858_s5] sm:$0xff]  ;;  %v1485_v15 = vld [vmem:[%s1858_s5 + $0x8] sm:$0xff]  ;;  %v1527_v21 = vld [vmem:[%s1858_s5 + $0x38] sm:$0xff]  ;;  %1277 = vset.pattern.permute.xlu0 %v1349_v24  ;;  %v1622_v61 = vsub.s32 0, %v610_v59 }
  0x22   :  { %1154 = vmatprep.subr.mxu0 %v1450_v3  ;;  %1171 = vmatprep.mubr.msk.f32.mxu1 %vm211_vm1, %v195_v8  ;;  %v1504_v18 = vld [vmem:[%s1858_s5 + $0x20] sm:$0xff]  ;;  %v1513_v19 = vld [vmem:[%s1858_s5 + $0x28] sm:$0xff]  ;;  %v1552_v39 = vld [vmem:[%s1859_s6 + $0x38] sm:$0xff] }
  0x23   :  { %1155 = vmatpush3.msra.mxu0 %v1450_v3  ;;  %v67_v22 = vld [vmem:[%s1856_s3] sm:$0xff]  ;;  %v68_v23 = vld [vmem:[%s1856_s3 + $0x8] sm:$0xff]  ;;  %v1557_v41 = vld [vmem:[%s1859_s6 + $0x30] sm:$0xff] }
  0x24   :  { %1156 = vmatprep.subr.mxu0 %v1458_v4  ;;  %v577_v25 = vld [vmem:[%s1865_s12] sm:$0xff]  ;;  %v578_v26 = vld [vmem:[%s1865_s12 + $0x8] sm:$0xff]  ;;  %v1581_v49 = vld [vmem:[%s1859_s6 + $0x18] sm:$0xff] }
  0x25   :  { %1157 = vmatpush3.msra.mxu0 %v1458_v4  ;;  %vm579_vm2 = vcmp.eq.s32.totalorder %v577_v25, 0  ;;  %vm580_vm3 = vcmp.eq.s32.totalorder %v578_v26, 0  ;;  %vm585_vm4 = vcmp.eq.s32.totalorder %v577_v25, 1  ;;  %v582_v27 = vstv %s581_s1  ;;  %v1565_v45 = vld [vmem:[%s1859_s6 + $0x28] sm:$0xff]  ;;  %v1573_v47 = vld [vmem:[%s1859_s6 + $0x20] sm:$0xff]  ;;  %v1589_v51 = vld [vmem:[%s1859_s6 + $0x10] sm:$0xff] }
  0x26   :  { %1159 = vmatmul.mubr.msk.f32.vlgmr.msra.gmra.mxu0 %vm73_vm0, %v64_v5  ;;  %v583_v28 = vsel %vm579_vm2, %v582_v27, 0  ;;  %v588_v29 = vstv %s1076_s2  ;;  %v584_v30 = vsel %vm580_vm3, %v582_v27, 0  ;;  %vm586_vm5 = vcmp.eq.s32.totalorder %v578_v26, 1  ;;  %v1597_v53 = vld [vmem:[%s1859_s6 + $0x8] sm:$0xff]  ;;  %v1605_v55 = vld [vmem:[%s1859_s6] sm:$0xff] }
  0x27   :  { %1161 = vmatprep.mubr.msk.f32.mxu0 %vm73_vm0, %v65_v6  ;;  %v589_v31 = vsel %vm585_vm4, %v588_v29, %v583_v28  ;;  %v590_v32 = vsel %vm586_vm5, %v588_v29, %v584_v30  ;;  %v1618_v58 = vld [vmem:[%s1863_s10] sm:$0x1] }
  0x28   :  { %597 = vperm.xlu1 %1276, %v589_v31   ;;  %vm625_vm6 = vcmp.eq.s32.totalorder %v1618_v58, 1  ;;  %vm607_vm7 = vcmp.eq.s32.totalorder %v1618_v58, 0  ;;  %vm642_vm8 = vcmp.eq.s32.totalorder %v1618_v58, 2  ;;  %vm659_vm9 = vcmp.eq.s32.totalorder %v1618_v58, 3 }
  0x29   :  { %v626_v62 = vsel %vm625_vm6, 1, %v1349_v24  ;;  %v608_v63 = vsel %vm607_vm7, 1, %v1349_v24  ;;  %v643_v2 = vsel %vm642_vm8, 1, %v1349_v24  ;;  %vm676_vm12 = vcmp.eq.s32.totalorder %v1618_v58, 4 }
  0x2a   :  { %1162 = vmatmul.mubr.msk.f32.gmra.mxu0 %vm73_vm0, %v66_v7  ;;  %v630_v5 = vrot.slane %v626_v62, %v1622_v61  ;;  %v612_v6 = vrot.slane %v608_v63, %v1622_v61  ;;  %v471_v7 = vld [vmem:[%s1861_s8 + $0x8] sm:$0xff]  ;;  %vm693_vm3 = vcmp.eq.s32.totalorder %v1618_v58, 5  ;;  %vm710_vm5 = vcmp.eq.s32.totalorder %v1618_v58, 6 }
  0x2b   :  { %1164 = vmatprep.mubr.msk.f32.mxu0 %vm73_vm0, %v67_v22  ;;  %vm727_vm7 = vcmp.eq.s32.totalorder %v1618_v58, 7  ;;  %v755_v62 = vld [vmem:[%s1860_s7 + $0x28] sm:$0xff] }
  0x2c   :  { %600 = vperm.xlu1 %1276, %v590_v32   ;;  %vm1642_vm10 = vcmp.eq.s32.totalorder %v630_v5, 1  ;;  %vm1646_vm11 = vcmp.eq.s32.totalorder %v612_v6, 1  ;;  %v677_v32 = vsel %vm676_vm12, 1, %v1349_v24 }
  0x2e   :  { %1165 = vmatmul.mubr.msk.f32.gmra.mxu0 %vm73_vm0, %v68_v23 }
  0x2f   :  { %1187 = vmatprep.mubr.msk.f32.mxu0 %vm211_vm1, %v195_v8  ;;  %v1077_v8 = vld [vmem:[%s1864_s11] ss:$0 sm:$0xff] }
  0xa3   :  { %v598_v60 = vpop.permute.xlu1 %597 }
  0xa4   :  { %vm602_vm2 = vcmp.lt.s32.totalorder %v1077_v8, %v598_v60 }
  0xe6   :  { %v1480_v9 = vpop.f32.mrf.mxu0 }
  0xe8   :  { %v158_v10 = vpop.f32.mrf.mxu0 }
  0xea   :  { %v1163_v11 = vpop.f32.mrf.mxu0 }
  0xeb   :  { %207 = vrot.lane.b32.xlu0 %v1163_v11, %s1348_s18 }
  0xec   :  { %v168_v12 = vpop.f32.mrf.mxu0 }
  0xef   :  { %205 = vrot.lane.b32.xlu0 %v168_v12, %s1348_s18  ;;  %v470_v12 = vld [vmem:[%s1861_s8] sm:$0xff]  ;;  %s1350_s8 = smov 64  }
 0x15d   :  { %v208_v13 = vpop.permute.xlu0 %207 }
 0x15e   :  { %1167 = vmatprep.subr.mxu1 %v208_v13 }
 0x15f   :  { %1168 = vmatpush3.msra.mxu1 %v208_v13  ;;  %v660_v13 = vsel %vm659_vm9, 1, %v1349_v24 }
 0x160   :  { %v664_v29 = vrot.slane %v660_v13, %v1622_v61  ;;  %v754_v13 = vld [vmem:[%s1860_s7 + $0x20] sm:$0xff] }
 0x161   :  { %v206_v14 = vpop.permute.xlu0 %205 }
 0x162   :  { %1169 = vmatprep.subr.mxu1 %v206_v14  ;;  %vm1676_vm4 = vcmp.eq.s32.totalorder %v664_v29, 1 }
 0x163   :  { %1170 = vmatpush3.msra.mxu1 %v206_v14 }
 0x164   :  { %1172 = vmatmul.mubr.msk.f32.vlgmr.msra.gmra.mxu1 %vm211_vm1, %v1485_v15 }
 0x165   :  { %1174 = vmatprep.mubr.msk.f32.mxu1 %vm211_vm1, %v1490_v16 }
 0x168   :  { %1175 = vmatmul.mubr.msk.f32.gmra.mxu1 %vm211_vm1, %v1499_v17 }
 0x169   :  { %1177 = vmatprep.mubr.msk.f32.mxu1 %vm211_vm1, %v1504_v18 }
 0x16c   :  { %1178 = vmatmul.mubr.msk.f32.gmra.mxu1 %vm211_vm1, %v1513_v19 }
 0x16d   :  { %1180 = vmatprep.mubr.msk.f32.mxu1 %vm211_vm1, %v1518_v20 }
 0x170   :  { %1181 = vmatmul.mubr.msk.f32.gmra.mxu1 %vm211_vm1, %v1527_v21 }
 0x171   :  { %1215 = vmatprep.mubr.msk.f32.mxu1 %vm73_vm0, %v158_v10  ;;  %v647_v10 = vrot.slane %v643_v2, %v1622_v61  ;;  %v728_v2 = vsel %vm727_vm7, 1, %v1349_v24 }
 0x173   :  { %vm1653_vm15 = vcmp.eq.s32.totalorder %v647_v10, 1 }
 0x224   :  { %v1173_v33 = vpop.f32.mrf.mxu1 }
 0x225   :  { %v342_v54 = vmul.f32 %v1173_v33, %v1597_v53 }
 0x226   :  { %v302_v34 = vpop.f32.mrf.mxu1 }
 0x227   :  { %v341_v56 = vmul.f32 %v302_v34, %v1605_v55 }
 0x228   :  { %v1176_v35 = vpop.f32.mrf.mxu1 }
 0x229   :  { %v344_v50 = vmul.f32 %v1176_v35, %v1581_v49 }
 0x22a   :  { %v312_v36 = vpop.f32.mrf.mxu1 }
 0x22b   :  { %v343_v52 = vmul.f32 %v312_v36, %v1589_v51 }
 0x22c   :  { %v1179_v37 = vpop.f32.mrf.mxu1 }
 0x22d   :  { %v346_v46 = vmul.f32 %v1179_v37, %v1565_v45 }
 0x22e   :  { %v322_v38 = vpop.f32.mrf.mxu1 }
 0x22f   :  { %v345_v48 = vmul.f32 %v322_v38, %v1573_v47  ;;  %v756_v38 = vld [vmem:[%s1860_s7 + $0x30] sm:$0xff] }
 0x230   :  { %v1182_v40 = vpop.f32.mrf.mxu1 }
 0x231   :  { %v348_v42 = vmul.f32 %v1182_v40, %v1552_v39  ;;  %v681_v40 = vrot.slane %v677_v32, %v1622_v61 }
 0x232   :  { %v332_v43 = vpop.f32.mrf.mxu1 }
 0x233   :  { %v347_v44 = vmul.f32 %v332_v43, %v1557_v41  ;;  %1199 = vmatprep.subr.msk.mxu1 %vm73_vm0, %v348_v42  ;;  %vm1691_vm6 = vcmp.eq.s32.totalorder %v681_v40, 1 }
 0x234   :  { %1200 = vmatpush3.xpose.msk.msra.mxu1 %vm73_vm0, %v348_v42  ;;  %v694_v42 = vsel %vm693_vm3, 1, %v1349_v24 }
 0x235   :  { %1201 = vmatprep.subr.msk.mxu1 %vm73_vm0, %v347_v44 }
 0x238   :  { %1202 = vmatpush3.xpose.msk.msra.mxu1 %vm73_vm0, %v347_v44 }
 0x239   :  { %1203 = vmatprep.subr.msk.mxu1 %vm73_vm0, %v346_v46 }
 0x23c   :  { %1204 = vmatpush3.xpose.msk.msra.mxu1 %vm73_vm0, %v346_v46 }
 0x23d   :  { %1205 = vmatprep.subr.msk.mxu1 %vm73_vm0, %v345_v48 }
 0x240   :  { %1206 = vmatpush3.xpose.msk.msra.mxu1 %vm73_vm0, %v345_v48 }
 0x241   :  { %1207 = vmatprep.subr.msk.mxu1 %vm73_vm0, %v344_v50 }
 0x244   :  { %1208 = vmatpush3.xpose.msk.msra.mxu1 %vm73_vm0, %v344_v50 }
 0x245   :  { %1209 = vmatprep.subr.msk.mxu1 %vm73_vm0, %v343_v52 }
 0x248   :  { %1210 = vmatpush3.xpose.msk.msra.mxu1 %vm73_vm0, %v343_v52  ;;  %v698_v52 = vrot.slane %v694_v42, %v1622_v61 }
 0x249   :  { %1211 = vmatprep.subr.msk.mxu1 %vm73_vm0, %v342_v54 }
 0x24a   :  { %vm1706_vm8 = vcmp.eq.s32.totalorder %v698_v52, 1 }
 0x24c   :  { %1212 = vmatpush3.xpose.msk.msra.mxu1 %vm73_vm0, %v342_v54  ;;  %v711_v54 = vsel %vm710_vm5, 1, %v1349_v24  ;;  %v732_v24 = vrot.slane %v728_v2, %v1622_v61 }
 0x24d   :  { %1213 = vmatprep.subr.msk.mxu1 %vm73_vm0, %v341_v56  ;;  %v715_v63 = vrot.slane %v711_v54, %v1622_v61 }
 0x24e   :  { %vm1733_vm12 = vcmp.eq.s32.totalorder %v732_v24, 1 }
 0x24f   :  { %vm1720_vm9 = vcmp.eq.s32.totalorder %v715_v63, 1 }
 0x250   :  { %1214 = vmatpush3.xpose.msk.msra.mxu1 %vm73_vm0, %v341_v56 }
 0x253   :  { %1216 = vmatmul.mubr.msk.f32.vlgmr.msra.gmra.mxu1 %vm73_vm0, %v1480_v9  ;;  %v601_v9 = vpop.permute.xlu1 %600 }
 0x254   :  { %vm603_vm13 = vcmp.lt.s32.totalorder %v1077_v8, %v601_v9 }
 0x313   :  { %v1217_v11 = vpop.f32.mrf.mxu1 }
 0x314   :  { %v574_v14 = vadd.f32 %v1217_v11, %v471_v7 }
 0x315   :  { %v568_v25 = vpop.f32.mrf.mxu1 }
 0x316   :  { %v1651_v26 = vsel %vm603_vm13, %v574_v14, -1000000.0  ;;  %v569_v27 = vadd.f32 %v568_v25, %v470_v12 }
 0x317   :  { %v633_v30 = vsel %vm1642_vm10, %v1651_v26, -1e+30  ;;  %v615_v31 = vsel %vm1646_vm11, %v1651_v26, -1e+30  ;;  %v650_v36 = vsel %vm1653_vm15, %v1651_v26, -1e+30 }
 0x318   :  { %v1665_v33 = vsel %vm602_vm2, %v569_v27, -1000000.0  ;;  %v637_v34 = vsel %vm616_vm14, %v633_v30, -inf  ;;  %v620_v35 = vsel %vm616_vm14, %v615_v31, -inf  ;;  %v654_v43 = vsel %vm616_vm14, %v650_v36, -inf  ;;  %v1166_v36 = vpop.f32.mrf.mxu0 }
 0x319   :  { %638 = vmax.xlane.f32.xlu0 %v637_v34  ;;  %621 = vmax.xlane.f32.xlu1 %v620_v35  ;;  %v649_v37 = vsel %vm1653_vm15, %v1665_v33, -1e+30  ;;  %v667_v46 = vsel %vm1676_vm4, %v1651_v26, -1e+30  ;;  %v666_v48 = vsel %vm1676_vm4, %v1665_v33, -1e+30 }
 0x31a   :  { %v651_v44 = vsel %vm616_vm14, %v649_v37, -inf  ;;  %v671_v56 = vsel %vm616_vm14, %v667_v46, -inf  ;;  %v668_v57 = vsel %vm616_vm14, %v666_v48, -inf  ;;  %v684_v59 = vsel %vm1691_vm6, %v1651_v26, -1e+30  ;;  %v178_v37 = vpop.f32.mrf.mxu0 }
 0x31b   :  { %v683_v60 = vsel %vm1691_vm6, %v1665_v33, -1e+30  ;;  %v688_v58 = vsel %vm616_vm14, %v684_v59, -inf  ;;  %v701_v6 = vsel %vm1706_vm8, %v1651_v26, -1e+30 }
 0x31c   :  { %v685_v5 = vsel %vm616_vm14, %v683_v60, -inf  ;;  %v700_v7 = vsel %vm1706_vm8, %v1665_v33, -1e+30  ;;  %v705_v9 = vsel %vm616_vm14, %v701_v6, -inf  ;;  %v718_v11 = vsel %vm1720_vm9, %v1651_v26, -1e+30 }
 0x31d   :  { %655 = vmax.xlane.f32.xlu0 %v654_v43  ;;  %652 = vmax.xlane.f32.xlu1 %v651_v44  ;;  %v702_v10 = vsel %vm616_vm14, %v700_v7, -inf  ;;  %v717_v12 = vsel %vm1720_vm9, %v1665_v33, -1e+30  ;;  %v722_v61 = vsel %vm616_vm14, %v718_v11, -inf  ;;  %v735_v25 = vsel %vm1733_vm12, %v1651_v26, -1e+30 }
 0x31e   :  { %v719_v14 = vsel %vm616_vm14, %v717_v12, -inf  ;;  %v734_v27 = vsel %vm1733_vm12, %v1665_v33, -1e+30  ;;  %v739_v29 = vsel %vm616_vm14, %v735_v25, -inf  ;;  %v614_v31 = vsel %vm1646_vm11, %v1665_v33, -1e+30 }
 0x31f   :  { %v736_v30 = vsel %vm616_vm14, %v734_v27, -inf  ;;  %v617_v32 = vsel %vm616_vm14, %v614_v31, -inf  ;;  %v632_v34 = vsel %vm1642_vm10, %v1665_v33, -1e+30 }
 0x320   :  { %v634_v35 = vsel %vm616_vm14, %v632_v34, -inf }
 0x321   :  { %672 = vmax.xlane.f32.xlu0 %v671_v56  ;;  %669 = vmax.xlane.f32.xlu1 %v668_v57 }
 0x325   :  { %689 = vmax.xlane.f32.xlu0 %v688_v58  ;;  %686 = vmax.xlane.f32.xlu1 %v685_v5 }
 0x329   :  { %706 = vmax.xlane.f32.xlu0 %v705_v9  ;;  %703 = vmax.xlane.f32.xlu1 %v702_v10 }
 0x32d   :  { %723 = vmax.xlane.f32.xlu0 %v722_v61  ;;  %720 = vmax.xlane.f32.xlu1 %v719_v14 }
 0x331   :  { %740 = vmax.xlane.f32.xlu0 %v739_v29  ;;  %737 = vmax.xlane.f32.xlu1 %v736_v30 }
 0x335   :  { %618 = vmax.xlane.f32.xlu0 %v617_v32  ;;  %v757_v32 = vld [vmem:[%s1860_s7 + $0x38] sm:$0xff] }
 0x339   :  { %635 = vmax.xlane.f32.xlu0 %v634_v35 }
 0x342   :  { %353 = vrot.lane.b32.xlu1 %v1166_v36, %s1350_s8 }
 0x346   :  { %938 = vrot.lane.b32.xlu1 %v1435_v0, %s1351_s4 }
 0x34a   :  { %936 = vrot.lane.b32.xlu1 %v1440_v1, %s1351_s4 }
 0x34e   :  { %932 = vrot.lane.b32.xlu1 %v1458_v4, %s1351_s4 }
 0x34f   :  { %351 = vrot.lane.b32.xlu0 %v178_v37, %s1350_s8 }
 0x353   :  { %934 = vrot.lane.b32.xlu0 %v1450_v3, %s1351_s4 }
 0x3a2   :  { %v639_v40 = vpop.xlane.xlu0 %638  ;;  %v622_v42 = vpop.xlane.xlu1 %621 }
 0x3a3   :  { %v624_v58 = vsel %vm1646_vm11, %v622_v42, 0.0 }
 0x3a4   :  { %v641_v5 = vsel %vm1642_vm10, %v639_v40, %v624_v58 }
 0x3a6   :  { %v656_v43 = vpop.xlane.xlu0 %655  ;;  %v653_v44 = vpop.xlane.xlu1 %652 }
 0x3a7   :  { %v658_v24 = vsel %vm1653_vm15, %v656_v43, %v641_v5 }
 0x3aa   :  { %v673_v46 = vpop.xlane.xlu0 %672  ;;  %v670_v48 = vpop.xlane.xlu1 %669 }
 0x3ab   :  { %v675_v9 = vsel %vm1676_vm4, %v673_v46, %v658_v24 }
 0x3ae   :  { %v690_v52 = vpop.xlane.xlu0 %689  ;;  %v687_v54 = vpop.xlane.xlu1 %686 }
 0x3af   :  { %v692_v10 = vsel %vm1691_vm6, %v690_v52, %v675_v9 }
 0x3b2   :  { %v707_v56 = vpop.xlane.xlu0 %706  ;;  %v704_v57 = vpop.xlane.xlu1 %703 }
 0x3b3   :  { %v709_v11 = vsel %vm1706_vm8, %v707_v56, %v692_v10 }
 0x3b6   :  { %v724_v59 = vpop.xlane.xlu0 %723  ;;  %v721_v60 = vpop.xlane.xlu1 %720 }
 0x3b7   :  { %v726_v14 = vsel %vm1720_vm9, %v724_v59, %v709_v11 }
 0x3ba   :  { %v741_v63 = vpop.xlane.xlu0 %740  ;;  %v738_v2 = vpop.xlane.xlu1 %737 }
 0x3bb   :  { %v743_v27 = vsel %vm1733_vm12, %v741_v63, %v726_v14 }
 0x3bc   :  { %v745_v22 = vsub.f32 %v1651_v26, %v743_v27 }
 0x3be   :  { %v619_v6 = vpop.xlane.xlu0 %618  ;;  %v354_v7 = vpop.permute.xlu1 %353  ;;  %v748_v8 = vmul.f32 1.442695, %v745_v22 }
 0x3bf   :  { %1183 = vmatprep.subr.mxu0 %v354_v7  ;;  %v623_v12 = vsel %vm1646_vm11, %v619_v6, 0.0 }
 0x3c0   :  { %1184 = vmatpush3.msra.mxu0 %v354_v7 }
 0x3c2   :  { %v636_v61 = vpop.xlane.xlu0 %635 }
 0x3c3   :  { %v640_v25 = vsel %vm1642_vm10, %v636_v61, %v623_v12 }
 0x3c4   :  { %v657_v29 = vsel %vm1653_vm15, %v653_v44, %v640_v25 }
 0x3c5   :  { %v674_v30 = vsel %vm1676_vm4, %v670_v48, %v657_v29 }
 0x3c6   :  { %v691_v23 = vsel %vm1691_vm6, %v687_v54, %v674_v30  ;;  %v352_v31 = vpop.permute.xlu0 %351 }
 0x3c7   :  { %v708_v34 = vsel %vm1706_vm8, %v704_v57, %v691_v23  ;;  %1185 = vmatprep.subr.mxu0 %v352_v31  ;;  %v843_v57 = vld [vmem:[#allocation4] sm:$0xff] }
 0x3c8   :  { %v725_v28 = vsel %vm1720_vm9, %v721_v60, %v708_v34  ;;  %1186 = vmatpush3.msra.mxu0 %v352_v31  ;;  %v844_v60 = vld [vmem:[#allocation4 + $0x8] sm:$0xff] }
 0x3c9   :  { %v742_v50 = vsel %vm1733_vm12, %v738_v2, %v725_v28  ;;  %1188 = vmatmul.mubr.msk.f32.vlgmr.msra.gmra.mxu0 %vm211_vm1, %v1485_v15  ;;  %1218 = vmatprep.subr.mxu0 %v757_v32  ;;  %v753_v15 = vld [vmem:[%s1860_s7 + $0x18] sm:$0xff] }
 0x3ca   :  { %v744_v26 = vsub.f32 %v1665_v33, %v742_v50  ;;  %1190 = vmatprep.mubr.msk.f32.mxu0 %vm211_vm1, %v1490_v16  ;;  %1219 = vmatpush3.msra.mxu0 %v757_v32  ;;  %v752_v16 = vld [vmem:[%s1860_s7 + $0x10] sm:$0xff]  ;;  %v935_v54 = vpop.permute.xlu0 %934 }
 0x3cb   :  { %1220 = vmatprep.subr.mxu0 %v756_v38 }
 0x3cc   :  { %v746_v35 = vmul.f32 1.442695, %v744_v26  ;;  %1221 = vmatpush3.msra.mxu0 %v756_v38 }
 0x3cd   :  { %1191 = vmatmul.mubr.msk.f32.gmra.mxu0 %vm211_vm1, %v1499_v17  ;;  %1222 = vmatprep.subr.mxu0 %v755_v62  ;;  %v751_v17 = vld [vmem:[%s1860_s7 + $0x8] sm:$0xff] }
 0x3ce   :  { %1278 = vpow2.f32 %v746_v35  ;;  %1193 = vmatprep.mubr.msk.f32.mxu0 %vm211_vm1, %v1504_v18  ;;  %1223 = vmatpush3.msra.mxu0 %v755_v62  ;;  %v750_v18 = vld [vmem:[%s1860_s7] sm:$0xff]  ;;  %s1352_s7 = smov [#allocation7]  }
 0x3cf   :  { %1280 = vpow2.f32 %v748_v8  ;;  %1224 = vmatprep.subr.mxu0 %v754_v13  ;;  %s1032_s15 = sshll.u32 %s1352_s7, 4  ;;  %s1033_s15 = int_to_ptr.vmem [resolvable:$true] %s1032_s15 }
 0x3d0   :  { %1225 = vmatpush3.msra.mxu0 %v754_v13  ;;  %s1318_s17 = scalar_lea.vmem %s1033_s15, 256  ;;  %p1323_p11 = scmp.lt.s32.totalorder %s1033_s15, %s1033_s15 }
 0x3d1   :  { %1194 = vmatmul.mubr.msk.f32.gmra.mxu0 %vm211_vm1, %v1513_v19  ;;  %1226 = vmatprep.subr.mxu0 %v753_v15  ;;  %p1319_p10 = scmp.ne.s32.totalorder %s1033_s15, %s1318_s17  ;;  %p1324_p12 = scmp.lt.s32.totalorder %s1318_s17, %s1318_s17 }
 0x3d2   :  { %1196 = vmatprep.mubr.msk.f32.mxu0 %vm211_vm1, %v1518_v20  ;;  %1227 = vmatpush3.msra.mxu0 %v753_v15 }
 0x3d3   :  { %1228 = vmatprep.subr.mxu0 %v752_v16  ;;  %p1325_p13 = por %p1324_p12, %p1323_p11 }
 0x3d4   :  { %1229 = vmatpush3.msra.mxu0 %v752_v16 }
 0x3d5   :  { %1197 = vmatmul.mubr.msk.f32.gmra.mxu0 %vm211_vm1, %v1527_v21  ;;  %1230 = vmatprep.subr.mxu0 %v751_v17  ;;  %p1326_p0 = pnand %p1325_p13, %p1319_p10 }
 0x3d6   :  { %1231 = vmatpush3.msra.mxu0 %v751_v17 }
 0x3d7   :  { %1232 = vmatprep.subr.mxu0 %v750_v18 }
 0x3d8   :  { %1233 = vmatpush3.msra.mxu0 %v750_v18 }
 0x3db   :  { %v1279_v19 = vpop.eup %1278 }
 0x3dc   :  { %v1281_v20 = vpop.eup %1280  ;;  %1234 = vmatprep.mubr.msk.f32.mxu0 %vm616_vm14, %v1279_v19 }
 0x3dd   :  { %1235 = vmatmul.mubr.msk.f32.vlgmr.msra.gmra.mxu0 %vm616_vm14, %v1281_v20 }
 0x489   :  { %v1189_v21 = vpop.f32.mrf.mxu0 }
 0x48b   :  { %v423_v33 = vpop.f32.mrf.mxu0 }
 0x48d   :  { %v1192_v36 = vpop.f32.mrf.mxu0 }
 0x48e   :  { %v465_v4 = vmul.f32 %v1192_v36, %v1581_v49 }
 0x48f   :  { %v433_v37 = vpop.f32.mrf.mxu0 }
 0x491   :  { %v1195_v40 = vpop.f32.mrf.mxu0 }
 0x492   :  { %v467_v0 = vmul.f32 %v1195_v40, %v1565_v45  ;;  %v462_v45 = vmul.f32 %v423_v33, %v1605_v55 }
 0x493   :  { %v443_v42 = vpop.f32.mrf.mxu0 }
 0x494   :  { %v466_v1 = vmul.f32 %v443_v42, %v1573_v47  ;;  %v939_v47 = vpop.permute.xlu1 %938 }
 0x495   :  { %v1198_v43 = vpop.f32.mrf.mxu0  ;;  %1256 = vmatprep.subr.mxu1 %v939_v47 }
 0x496   :  { %v469_v44 = vmul.f32 %v1198_v43, %v1552_v39  ;;  %v464_v39 = vmul.f32 %v433_v37, %v1589_v51  ;;  %1257 = vmatpush3.msra.mxu1 %v939_v47 }
 0x497   :  { %v453_v46 = vpop.f32.mrf.mxu0 }
 0x498   :  { %v468_v48 = vmul.f32 %v453_v46, %v1557_v41  ;;  %1237 = vmatprep.subr.mxu0 %v469_v44  ;;  %v463_v41 = vmul.f32 %v1189_v21, %v1597_v53  ;;  %v937_v49 = vpop.permute.xlu1 %936 }
 0x499   :  { %1238 = vmatpush3.msra.mxu0 %v469_v44  ;;  %1258 = vmatprep.subr.mxu1 %v937_v49 }
 0x49a   :  { %1239 = vmatprep.subr.mxu0 %v468_v48  ;;  %1259 = vmatpush3.msra.mxu1 %v937_v49 }
 0x49b   :  { %1240 = vmatpush3.msra.mxu0 %v468_v48  ;;  %1260 = vmatprep.subr.mxu1 %v935_v54 }
 0x49c   :  { %1241 = vmatprep.subr.mxu0 %v467_v0  ;;  %1261 = vmatpush3.msra.mxu1 %v935_v54  ;;  %v933_v2 = vpop.permute.xlu1 %932 }
 0x49d   :  { %v1236_v3 = vpop.f32.mrf.mxu0  ;;  %1242 = vmatpush3.msra.mxu0 %v467_v0  ;;  %1262 = vmatprep.subr.mxu1 %v933_v2 }
 0x49e   :  { %1282 = vrcp.f32 %v1236_v3  ;;  %1243 = vmatprep.subr.mxu0 %v466_v1  ;;  %1263 = vmatpush3.msra.mxu1 %v933_v2 }
 0x49f   :  { %v830_v52 = vpop.f32.mrf.mxu0  ;;  %1244 = vmatpush3.msra.mxu0 %v466_v1 }
 0x4a0   :  { %1284 = vrcp.f32 %v830_v52  ;;  %1245 = vmatprep.subr.mxu0 %v465_v4 }
 0x4a1   :  { %1246 = vmatpush3.msra.mxu0 %v465_v4 }
 0x4a2   :  { %1247 = vmatprep.subr.mxu0 %v464_v39 }
 0x4a3   :  { %1248 = vmatpush3.msra.mxu0 %v464_v39 }
 0x4a4   :  { %1249 = vmatprep.subr.mxu0 %v463_v41 }
 0x4a5   :  { %1250 = vmatpush3.msra.mxu0 %v463_v41 }
 0x4a6   :  { %1251 = vmatprep.subr.mxu0 %v462_v45 }
 0x4a7   :  { %1252 = vmatpush3.msra.mxu0 %v462_v45 }
 0x4ab   :  { %v1283_v56 = vpop.eup %1282 }
 0x4ac   :  { %v842_v59 = vmul.f32 %v1283_v56, %v1281_v20 }
 0x4ad   :  { %v1285_v51 = vpop.eup %1284 }
 0x4ae   :  { %v841_v53 = vmul.f32 %v1285_v51, %v1279_v19  ;;  %v846_v63 = vmul.f32 %v844_v60, %v842_v59 }
 0x4b0   :  { %v845_v55 = vmul.f32 %v843_v57, %v841_v53 }
 0x4b2   :  { %1253 = vmatprep.mubr.msk.f32.mxu0 %vm616_vm14, %v845_v55 }
 0x4b3   :  { %1254 = vmatmul.mubr.msk.f32.vlgmr.msra.gmra.mxu0 %vm616_vm14, %v846_v63 }
 0x573   :  { %v1255_v58 = vpop.f32.mrf.mxu0 }
 0x575   :  { %v919_v5 = vpop.f32.mrf.mxu0 }
 0x576   :  { %1264 = vmatprep.mubr.msk.f32.mxu1 %vm73_vm0, %v919_v5 }
 0x577   :  { %1265 = vmatmul.mubr.msk.f32.vlgmr.msra.gmra.mxu1 %vm73_vm0, %v1255_v58 }
 0x637   :  { %v1266_v6 = vpop.f32.mrf.mxu1 }
 0x638   :  { %1026 = vst.msk [vmem:[#allocation7 + $0x8] sm:$0xff] %vm73_vm0, %v1266_v6 }
 0x639   :  { %v1016_v7 = vpop.f32.mrf.mxu1 }
 0x63a   :  { %1025 = vst.msk [vmem:[#allocation7] sm:$0xff] %vm73_vm0, %v1016_v7 }
 0x63b   :  { %1329 = shalt.err (!%p1326_p0)
}
 0x63c   :  { %1038 = dma.vmem_to_hbm [thread:$0]  %s1033_s15, 256, %s1866_s13, [#allocation6], %s1346_s0, %s1346_s0, %s1347_s16  }
 0x63d   :  { %1342 = dma.done.wait [#allocation6], 256  }
 0x63e   :  { %1343 = vsyncadd [#allocation6], 4294967040 }
 0x63f   :  { %1042 = vsyncpa [#allocation5], 1 }
 0x640   :  { %1043 = vsyncpa [#allocation6], 1 }

</bundles_post_ra>
